<compile_context>
chip_gen: v7x
topology: tpu7x:2x2x1
jax: 0.10.0
libtpu: 0.0.40
codegen_flags: <defaults>
</compile_context>

<pallas_src>
import functools

import jax
import jax.numpy as jnp
from jax import lax
from jax.experimental import pallas as pl
from jax.experimental.pallas import tpu as pltpu


_FUSED_VMEM_BUDGET = 20 * 1024 * 1024   # fits v7x's 32 MiB scoped default w/ headroom
_TILE_TARGET_BYTES = 2 * 1024 * 1024    # per spatial tile of one image (tiled path)


def _mlp_attention(pooled, w1t_ref, b1_ref, w2_ref, b2_ref):
    """pooled: (C, 1) f32 channel means -> (C, 1) f32 sigmoid attention.

    Pure VPU/XLU: broadcast multiply + tiny reductions, no relayouts, no MXU.
    """
    # h_r = relu( sum_c W1[r, c] * pooled_c + b1_r )   -> (1, Cr)
    h = jnp.sum(w1t_ref[...] * pooled, axis=0, keepdims=True) + b1_ref[...]
    h = jnp.maximum(h, 0.0)
    # z_c = sum_r W2[c, r] * h_r + b2_c                -> (C, 1)
    z = jnp.sum(w2_ref[...] * h, axis=1, keepdims=True) + b2_ref[...]
    return 1.0 / (1.0 + jnp.exp(-z))                   # sigmoid (EUP)


# ---------------------------------------------------------------------------
# Fused single-pass kernel: pool + MLP + scale, one grid step per image.
# ---------------------------------------------------------------------------
def _ca_fused_kernel(x_ref, w1t_ref, b1_ref, w2_ref, b2_ref, o_ref):
    # x_ref/o_ref: (1, C, HW) ; weights stay resident via constant index_map.
    x = x_ref[0].astype(jnp.float32)                                   # (C, HW)
    pooled = jnp.sum(x, axis=-1, keepdims=True) * (1.0 / x.shape[-1])  # (C, 1)
    attn = _mlp_attention(pooled, w1t_ref, b1_ref, w2_ref, b2_ref)     # (C, 1)
    o_ref[0] = (x * attn).astype(o_ref.dtype)


# ---------------------------------------------------------------------------
# Tiled path, kernel 1: global-average-pool accumulation + MLP at last tile.
# ---------------------------------------------------------------------------
def _ca_pool_mlp_kernel(x_ref, w1t_ref, b1_ref, w2_ref, b2_ref, attn_ref,
                        acc_ref, *, hw, ts):
    s = pl.program_id(1)

    @pl.when(s == 0)
    def _():
        acc_ref[...] = jnp.zeros_like(acc_ref)

    x = x_ref[0].astype(jnp.float32)                                   # (C, TS)
    if hw % ts != 0:  # ragged last tile: mask out-of-bounds lanes (trace-time gate)
        lane = lax.broadcasted_iota(jnp.int32, x.shape, 1)
        x = jnp.where(s * ts + lane < hw, x, 0.0)
    acc_ref[...] += jnp.sum(x, axis=-1, keepdims=True)                 # (C, 1)

    @pl.when(s == pl.num_programs(1) - 1)
    def _():
        pooled = acc_ref[...] * (1.0 / hw)
        attn = _mlp_attention(pooled, w1t_ref, b1_ref, w2_ref, b2_ref)
        attn_ref[0] = attn.astype(attn_ref.dtype)


# ---------------------------------------------------------------------------
# Tiled path, kernel 2: broadcast channel-scale (lane-dense, fully parallel).
# ---------------------------------------------------------------------------
def _ca_scale_kernel(x_ref, attn_ref, o_ref):
    o_ref[0] = (x_ref[0].astype(jnp.float32) * attn_ref[0]).astype(o_ref.dtype)


def channel_attention(x, w1, b1, w2, b2, *, spatial_tile=None):
    """ChannelAttentionLayer forward.

    x: (N, C, H, W); w1: (Cr, C, 1, 1); b1: (Cr,); w2: (C, Cr, 1, 1); b2: (C,).
    """
    N, C, H, W = x.shape
    Cr = w1.shape[0]
    HW = H * W
    itemsize = x.dtype.itemsize

    # Free views / tiny parameter reshapes (no big-tensor HBM passes).
    x_flat = x.reshape(N, C, HW)
    w1t = w1.reshape(Cr, C).T.astype(jnp.float32)    # (C, Cr)
    w2m = w2.reshape(C, Cr).astype(jnp.float32)      # (C, Cr)
    b1r = b1.reshape(1, Cr).astype(jnp.float32)
    b2c = b2.reshape(C, 1).astype(jnp.float32)

    per_image_bytes = C * HW * itemsize
    # in + out, double-buffered -> ~4x one image resident in VMEM.
    use_fused = spatial_tile is None and 4 * per_image_bytes <= _FUSED_VMEM_BUDGET

    if use_fused:
        out_flat = pl.pallas_call(
            _ca_fused_kernel,
            out_shape=jax.ShapeDtypeStruct((N, C, HW), x.dtype),
            grid_spec=pltpu.PrefetchScalarGridSpec(
                num_scalar_prefetch=0,
                grid=(N,),
                in_specs=[
                    pl.BlockSpec((1, C, HW), lambda n: (n, 0, 0)),
                    pl.BlockSpec((C, Cr), lambda n: (0, 0)),
                    pl.BlockSpec((1, Cr), lambda n: (0, 0)),
                    pl.BlockSpec((C, Cr), lambda n: (0, 0)),
                    pl.BlockSpec((C, 1), lambda n: (0, 0)),
                ],
                out_specs=pl.BlockSpec((1, C, HW), lambda n: (n, 0, 0)),
            ),
            compiler_params=pltpu.CompilerParams(
                dimension_semantics=("parallel",)),
            cost_estimate=pl.CostEstimate(
                flops=2 * N * C * HW + 4 * N * C * Cr,
                transcendentals=N * C,
                bytes_accessed=2 * N * C * HW * itemsize),
        )(x_flat, w1t, b1r, w2m, b2c)
        return out_flat.reshape(N, C, H, W)

    # ----- tiled path (large images, or forced tile for testing) -----
    if spatial_tile is not None:
        ts = int(spatial_tile)
    else:
        cap = max(128, (_TILE_TARGET_BYTES // max(1, C * itemsize)) // 128 * 128)
        ts = HW if HW <= cap else cap          # full dim, or a multiple of 128
    num_s = pl.cdiv(HW, ts)

    attn = pl.pallas_call(
        functools.partial(_ca_pool_mlp_kernel, hw=HW, ts=ts),
        out_shape=jax.ShapeDtypeStruct((N, C, 1), jnp.float32),
        grid_spec=pltpu.PrefetchScalarGridSpec(
            num_scalar_prefetch=0,
            grid=(N, num_s),
            in_specs=[
                pl.BlockSpec((1, C, ts), lambda n, s: (n, 0, s)),
                pl.BlockSpec((C, Cr), lambda n, s: (0, 0)),
                pl.BlockSpec((1, Cr), lambda n, s: (0, 0)),
                pl.BlockSpec((C, Cr), lambda n, s: (0, 0)),
                pl.BlockSpec((C, 1), lambda n, s: (0, 0)),
            ],
            out_specs=pl.BlockSpec((1, C, 1), lambda n, s: (n, 0, 0)),
            scratch_shapes=[pltpu.VMEM((C, 1), jnp.float32)],
        ),
        compiler_params=pltpu.CompilerParams(
            dimension_semantics=("parallel", "arbitrary")),
        cost_estimate=pl.CostEstimate(
            flops=N * C * HW + 4 * N * C * Cr,
            transcendentals=N * C,
            bytes_accessed=N * C * HW * itemsize),
    )(x_flat, w1t, b1r, w2m, b2c)

    out_flat = pl.pallas_call(
        _ca_scale_kernel,
        out_shape=jax.ShapeDtypeStruct((N, C, HW), x.dtype),
        grid_spec=pltpu.PrefetchScalarGridSpec(
            num_scalar_prefetch=0,
            grid=(N, num_s),
            in_specs=[
                pl.BlockSpec((1, C, ts), lambda n, s: (n, 0, s)),
                pl.BlockSpec((1, C, 1), lambda n, s: (n, 0, 0)),
            ],
            out_specs=pl.BlockSpec((1, C, ts), lambda n, s: (n, 0, s)),
        ),
        compiler_params=pltpu.CompilerParams(
            dimension_semantics=("parallel", "parallel")),
        cost_estimate=pl.CostEstimate(
            flops=N * C * HW,
            transcendentals=0,
            bytes_accessed=2 * N * C * HW * itemsize),
    )(x_flat, attn)
    return out_flat.reshape(N, C, H, W)


def _reference(x, w1, b1, w2, b2):
    """Pure-JAX reference matching the PyTorch module."""
    N, C, H, W = x.shape
    Cr = w1.shape[0]
    pooled = jnp.mean(x.astype(jnp.float32), axis=(2, 3))          # (N, C)
    h = pooled @ w1.reshape(Cr, C).T + b1                          # (N, Cr)
    h = jnp.maximum(h, 0.0)
    z = h @ w2.reshape(C, Cr).T + b2                               # (N, C)
    a = jax.nn.sigmoid(z)
    return (x.astype(jnp.float32) * a[:, :, None, None]).astype(x.dtype)


if __name__ == "__main__":
    # Small deterministic example: batch=2, channels=4, spatial=16, reduction=2.
    N, C, H, W = 2, 4, 16, 16
    reduction = 2
    Cr = C // reduction

    key = jax.random.PRNGKey(0)
    kx, k1, kb1, k2, kb2 = jax.random.split(key, 5)
    x = jax.random.normal(kx, (N, C, H, W), dtype=jnp.float32)
    w1 = jax.random.normal(k1, (Cr, C, 1, 1), dtype=jnp.float32) / jnp.sqrt(C)
    b1 = jax.random.normal(kb1, (Cr,), dtype=jnp.float32) * 0.1
    w2 = jax.random.normal(k2, (C, Cr, 1, 1), dtype=jnp.float32) / jnp.sqrt(Cr)
    b2 = jax.random.normal(kb2, (C,), dtype=jnp.float32) * 0.1

    ref = _reference(x, w1, b1, w2, b2)

    # Fused single-pass path (image fits VMEM budget).
    out_fused = jax.block_until_ready(channel_attention(x, w1, b1, w2, b2))
    assert out_fused.shape == (N, C, H, W), out_fused.shape
    assert jnp.allclose(out_fused, ref, rtol=1e-5, atol=1e-5), "fused path mismatch"

    # Tiled (pool/MLP + scale) path, forced 128-lane spatial tile to exercise it.
    out_tiled = jax.block_until_ready(
        channel_attention(x, w1, b1, w2, b2, spatial_tile=128))
    assert out_tiled.shape == (N, C, H, W), out_tiled.shape
    assert jnp.allclose(out_tiled, ref, rtol=1e-5, atol=1e-5), "tiled path mismatch"

    print("KERNEL_OK")
</pallas_src>

<mosaic_0001>
module attributes {stable_mosaic.version = 11 : i64} {
  func.func @_ca_fused_kernel(%arg0: i32, %arg1: memref<1x4x256xf32, #tpu.memory_space<vmem>>, %arg2: memref<4x2xf32, #tpu.memory_space<vmem>>, %arg3: memref<1x2xf32, #tpu.memory_space<vmem>>, %arg4: memref<4x2xf32, #tpu.memory_space<vmem>>, %arg5: memref<4x1xf32, #tpu.memory_space<vmem>>, %arg6: memref<1x4x256xf32, #tpu.memory_space<vmem>>) attributes {dimension_semantics = [#tpu.dimension_semantics<parallel>], iteration_bounds = array<i64: 2>, scalar_prefetch = 0 : i64, scratch_operands = 0 : i64, tpu.core_type = #tpu.core_type<tc>, window_params = [{transform_indices = @transform_0, window_bounds = array<i64: 1, 4, 256>}, {pipeline_mode = #tpu.pipeline_mode<synchronous>, transform_indices = @transform_1, window_bounds = array<i64: 4, 2>}, {pipeline_mode = #tpu.pipeline_mode<synchronous>, transform_indices = @transform_2, window_bounds = array<i64: 1, 2>}, {pipeline_mode = #tpu.pipeline_mode<synchronous>, transform_indices = @transform_3, window_bounds = array<i64: 4, 2>}, {pipeline_mode = #tpu.pipeline_mode<synchronous>, transform_indices = @transform_4, window_bounds = array<i64: 4, 1>}, {transform_indices = @transform_5, window_bounds = array<i64: 1, 4, 256>}]} {
    %c0 = arith.constant 0 : index
    %c0_0 = arith.constant 0 : index
    %c0_1 = arith.constant 0 : index
    %0 = vector.load %arg1[%c0, %c0_0, %c0_1] : memref<1x4x256xf32, #tpu.memory_space<vmem>>, vector<1x4x256xf32>
    %1 = vector.shape_cast %0 : vector<1x4x256xf32> to vector<4x256xf32>
    %cst = arith.constant dense<0.000000e+00> : vector<4xf32>
    %2 = vector.multi_reduction <add>, %1, %cst [1] : vector<4x256xf32> to vector<4xf32>
    %3 = vector.shape_cast %2 : vector<4xf32> to vector<4x1xf32>
    %cst_2 = arith.constant 3.906250e-03 : f32
    %4 = vector.broadcast %cst_2 : f32 to vector<4x1xf32>
    %5 = arith.mulf %3, %4 : vector<4x1xf32>
    %c0_3 = arith.constant 0 : index
    %c0_4 = arith.constant 0 : index
    %6 = vector.load %arg2[%c0_3, %c0_4] : memref<4x2xf32, #tpu.memory_space<vmem>>, vector<4x2xf32>
    %7 = vector.broadcast %5 : vector<4x1xf32> to vector<4x2xf32>
    %8 = arith.mulf %6, %7 : vector<4x2xf32>
    %cst_5 = arith.constant dense<0.000000e+00> : vector<2xf32>
    %9 = vector.multi_reduction <add>, %8, %cst_5 [0] : vector<4x2xf32> to vector<2xf32>
    %10 = vector.shape_cast %9 : vector<2xf32> to vector<1x2xf32>
    %c0_6 = arith.constant 0 : index
    %c0_7 = arith.constant 0 : index
    %11 = vector.load %arg3[%c0_6, %c0_7] : memref<1x2xf32, #tpu.memory_space<vmem>>, vector<1x2xf32>
    %12 = arith.addf %10, %11 : vector<1x2xf32>
    %cst_8 = arith.constant 0.000000e+00 : f32
    %13 = vector.broadcast %cst_8 : f32 to vector<1x2xf32>
    %14 = arith.maximumf %12, %13 : vector<1x2xf32>
    %c0_9 = arith.constant 0 : index
    %c0_10 = arith.constant 0 : index
    %15 = vector.load %arg4[%c0_9, %c0_10] : memref<4x2xf32, #tpu.memory_space<vmem>>, vector<4x2xf32>
    %16 = vector.broadcast %14 : vector<1x2xf32> to vector<4x2xf32>
    %17 = arith.mulf %15, %16 : vector<4x2xf32>
    %cst_11 = arith.constant dense<0.000000e+00> : vector<4xf32>
    %18 = vector.multi_reduction <add>, %17, %cst_11 [1] : vector<4x2xf32> to vector<4xf32>
    %19 = vector.shape_cast %18 : vector<4xf32> to vector<4x1xf32>
    %c0_12 = arith.constant 0 : index
    %c0_13 = arith.constant 0 : index
    %20 = vector.load %arg5[%c0_12, %c0_13] : memref<4x1xf32, #tpu.memory_space<vmem>>, vector<4x1xf32>
    %21 = arith.addf %19, %20 : vector<4x1xf32>
    %cst_14 = arith.constant 0.000000e+00 : f32
    %22 = vector.broadcast %cst_14 : f32 to vector<4x1xf32>
    %23 = arith.subf %22, %21 : vector<4x1xf32>
    %24 = math.exp %23 : vector<4x1xf32>
    %cst_15 = arith.constant 1.000000e+00 : f32
    %25 = vector.broadcast %cst_15 : f32 to vector<4x1xf32>
    %26 = arith.addf %25, %24 : vector<4x1xf32>
    %cst_16 = arith.constant 1.000000e+00 : f32
    %27 = vector.broadcast %cst_16 : f32 to vector<4x1xf32>
    %28 = arith.divf %27, %26 : vector<4x1xf32>
    %29 = vector.broadcast %28 : vector<4x1xf32> to vector<4x256xf32>
    %30 = arith.mulf %1, %29 : vector<4x256xf32>
    %c0_17 = arith.constant 0 : index
    %c0_18 = arith.constant 0 : index
    %c0_19 = arith.constant 0 : index
    %31 = vector.load %arg6[%c0_17, %c0_18, %c0_19] : memref<1x4x256xf32, #tpu.memory_space<vmem>>, vector<1x4x256xf32>
    %32 = vector.shape_cast %31 : vector<1x4x256xf32> to vector<4x256xf32>
    %33 = vector.shape_cast %30 : vector<4x256xf32> to vector<1x4x256xf32>
    tpu.vector_store %arg6[%c0_17, %c0_18, %c0_19], %33 {strides = array<i32>} : memref<1x4x256xf32, #tpu.memory_space<vmem>>, vector<1x4x256xf32>,
    return
  }
  func.func @transform_0(%arg0: i32) -> (i32, i32, i32) {
    %c0_i32 = arith.constant 0 : i32
    %c0_i32_0 = arith.constant 0 : i32
    %c0_i32_1 = arith.constant 0 : i32
    return %arg0, %c0_i32, %c0_i32_0 : i32, i32, i32
  }
  func.func @transform_1(%arg0: i32) -> (i32, i32) {
    %c0_i32 = arith.constant 0 : i32
    %c0_i32_0 = arith.constant 0 : i32
    %c0_i32_1 = arith.constant 0 : i32
    return %c0_i32, %c0_i32_0 : i32, i32
  }
  func.func @transform_2(%arg0: i32) -> (i32, i32) {
    %c0_i32 = arith.constant 0 : i32
    %c0_i32_0 = arith.constant 0 : i32
    %c0_i32_1 = arith.constant 0 : i32
    return %c0_i32, %c0_i32_0 : i32, i32
  }
  func.func @transform_3(%arg0: i32) -> (i32, i32) {
    %c0_i32 = arith.constant 0 : i32
    %c0_i32_0 = arith.constant 0 : i32
    %c0_i32_1 = arith.constant 0 : i32
    return %c0_i32, %c0_i32_0 : i32, i32
  }
  func.func @transform_4(%arg0: i32) -> (i32, i32) {
    %c0_i32 = arith.constant 0 : i32
    %c0_i32_0 = arith.constant 0 : i32
    %c0_i32_1 = arith.constant 0 : i32
    return %c0_i32, %c0_i32_0 : i32, i32
  }
  func.func @transform_5(%arg0: i32) -> (i32, i32, i32) {
    %c0_i32 = arith.constant 0 : i32
    %c0_i32_0 = arith.constant 0 : i32
    %c0_i32_1 = arith.constant 0 : i32
    return %arg0, %c0_i32, %c0_i32_0 : i32, i32, i32
  }
}

</mosaic_0001>

<bundles_post_ra>
// kernel: tpu_custom_call.1
= control target key start
LH: loop header
LB: loop body
LE: loop exit
PB: predicated region body
PF: predicated region fallthrough
CT: control target
= control target key end

     0   :  { %10 = vsyncpa [#allocation3], 0  ;;  %s625_s0 = inlined_call_operand.vmem [shape: f32[2,4,256], index: 0, kind: input, shape index: {}]   ;;  %s626_s1 = inlined_call_operand.vmem [shape: f32[4,2], index: 1, kind: input, shape index: {}]   ;;  %s627_s2 = inlined_call_operand.vmem [shape: f32[1,2], index: 2, kind: input, shape index: {}]   ;;  %s628_s3 = inlined_call_operand.vmem [shape: f32[4,2], index: 3, kind: input, shape index: {}]   ;;  %s629_s4 = inlined_call_operand.vmem [shape: f32[4,1], index: 4, kind: input, shape index: {}]   ;;  %s630_s5 = inlined_call_operand.hbm [shape: f32[2,4,256], index: 5, kind: output, shape index: {}]  }
   0x1   :  { %12 = vsyncpa [#allocation3 + $0x1], 0  ;;  %s511_s18 = smov 0   ;;  %s513_s19 = smov 0  }
   0x2   :  { %s515_s20 = smov 0   ;;  %s517_s21 = smov 0  }
   0x3 LB: > { %s532_s22 = sadd.s32 4294967295, %s476_s21   ;;  %s352_s23 = sadd.s32 4294967294, %s476_s21   ;;  %s476_s21 = sphi %s517_s21, %s636_s21   ;;  %s472_s20 = sphi %s515_s20, %s635_s20   ;;  %s468_s19 = sphi %s513_s19, %s634_s19   ;;  %s464_s18 = sphi %s511_s18, %s633_s18  }
   0x4   : > { %s536_s24 = sadd.s32 1, %s476_s21   ;;  %s135_s25 = sadd.s32 1, %s472_s20 }
   0x5   : > { %s132_s26 = ssub.s32 %s476_s21, %s536_s24  ;;  %p145_p0 = scmp.ne.s32.totalorder %s472_s20, %s468_s19 }
   0x6   : > { %p133_p1 = scmp.eq.s32.totalorder %s132_s26, 0  ;;  %p146_p2 = scmp.eq.s32.totalorder %s532_s22, 1 }
   0x7   : > { %p151_p3 = scmp.ne.s32.totalorder %s468_s19, %s464_s18  ;;  %p152_p4 = scmp.eq.s32.totalorder %s352_s23, 1 }
   0x8   : > { %s547_s27 = scalar_select %p133_p1, %s472_s20, %s135_s25  }
   0x9   : > { %p549_p5 = por %p146_p2, %p145_p0  ;;  %p553_p6 = por %p152_p4, %p151_p3 }
   0xa   : > { %p355_p7 = scmp.ge.s32.totalorder %s476_s21, 1  ;;  %p190_p8 = scmp.lt.s32.totalorder %s476_s21, 3 }
   0xc   : > { %p191_p9 = pnand %p355_p7, %p190_p8 }
   0xd   : > { %p218_p10 = scmp.lt.s32.totalorder (!%p191_p9), %s532_s22, 1  ;;  %vm227_vm0 = vcmask (!%p191_p9), 1043456   ;;  %v234_v5 = vld [vmem:[%s626_s1] sm:$0xf] (!%p191_p9)  ;;  %vm236_vm1 = vcmask (!%p191_p9), 11264   ;;  %v248_v13 = vlaneseq (!%p191_p9)  ;;  %v478_v26 = vmov (!%p191_p9), 0  }
   0xe   : > { %194 = sbr.rel (%p191_p9) target bundleno = 517 (0x205), region = 40  ;;  %v244_v17 = vld [vmem:[%s627_s2] sm:$0x1] (!%p191_p9)  ;;  %407 = vset.pattern.permute.xlu1 (!%p191_p9), %v478_v26  ;;  %408 = vset.pattern.permute.xlu0 (!%p191_p9), %v478_v26  ;;  %v479_v35 = vmov (!%p191_p9), 839922192   ;;  %s215_s23 = sand.u32 (!%p191_p9), 1, %s468_s19  }
   0xf   : > { %v249_v16 = vshrl.u32 (!%p191_p9), %v248_v13, 7  ;;  %v247_v22 = vld [vmem:[%s628_s3] sm:$0xf] (!%p191_p9)  ;;  %v269_v36 = vunpack.c.l.s4 (!%p191_p9), %v479_v35  ;;  %s356_s25 = sshll.u32 (!%p191_p9), %s215_s23, 3  ;;  %s365_s26 = sshll.u32 (!%p191_p9), %s532_s22, 7 }
  0x10   : > { %v256_v27 = vld [vmem:[%s629_s4] sm:$0xf] (!%p191_p9)  ;;  %s279_s10 = scalar_lea.sflag (!%p191_p9), [#allocation3], %s215_s23 }
  0x11   : > { %v250_v20 = vsub.s32 (!%p191_p9), 0, %v249_v16  ;;  %v270_v37 = vunpack.c.0.s8 (!%p191_p9), %v269_v36 }
  0x13   : > { %v273_v38 = vsub.s32 (!%p191_p9), %v270_v37, %v249_v16 }
  0x15   : > { %s219_s30 = scalar_select %p218_p10, %s532_s22, 1 }
  0x16   : > { %s480_s22 = smov [#allocation2]  }
  0x17   : > { %s364_s6 = sshll.u32 %s219_s30, 3  ;;  %s217_s30 = scalar_lea.vmem [#allocation2], %s356_s25 }
  0x18   : > { %s222_s9 = scalar_lea.vmem %s625_s0, %s364_s6  ;;  %s293_s6 = sshll.u32 %s217_s30, 4  ;;  %s585_s6 = int_to_ptr.vmem [resolvable:$true] %s293_s6 }
  0x19   : > { %v223_v0 = vld [vmem:[%s222_s9] sm:$0xff]  ;;  %s583_s9 = scalar_lea.hbm %s630_s5, %s365_s26  ;;  %s414_s11 = scalar_lea.vmem %s585_s6, 128 }
  0x1a   : > { %v225_v1 = vcombine.high %v223_v0, %v223_v0  ;;  %v228_v2 = vsel %vm227_vm0, %v223_v0, 0.0  ;;  %p415_p11 = scmp.ne.s32.totalorder %s585_s6, %s414_s11  ;;  %s418_s12 = sshll.u32 %s480_s22, 4  ;;  %s419_s12 = int_to_ptr.vmem [resolvable:$false] %s418_s12 }
  0x1b   : > { %s420_s13 = scalar_lea.vmem %s419_s12, 256  ;;  %p421_p0 = scmp.lt.s32.totalorder %s585_s6, %s419_s12 }
  0x1c   : > { %v229_v3 = vsel %vm227_vm0, %v225_v1, 0.0  ;;  %p416_p12 = pnand %p415_p11, %p549_p5  ;;  %p422_p1 = scmp.lt.s32.totalorder %s420_s13, %s414_s11 }
  0x1d   : > { %v230_v4 = vadd.f32 %v229_v3, %v228_v2 }
  0x1e   : > { %p417_p13 = pneg %p416_p12  ;;  %p423_p2 = por %p422_p1, %p421_p0 }
  0x1f   : > { %231 = vadd.xlane.f32.xlu0 %v230_v4 }
  0x20   : > { %p424_p3 = pnand %p423_p2, %p417_p13 }
  0xac   : > { %v232_v6 = vpop.xlane.xlu0 %231 }
  0xad   : > { %v233_v7 = vmul.f32 0.00390625, %v232_v6 }
  0xaf   : > { %v235_v8 = vmul.f32 %v234_v5, %v233_v7 }
  0xb1   : > { %v237_v9 = vsel %vm236_vm1, %v235_v8, 0.0 }
  0xb2   : > { %v238_v10 = vrot.slane %v237_v9, 4 }
  0xb4   : > { %v239_v11 = vadd.f32 %v238_v10, %v237_v9 }
  0xb6   : > { %v240_v12 = vrot.slane %v239_v11, 2 }
  0xb8   : > { %v241_v14 = vadd.f32 %v240_v12, %v239_v11 }
  0xba   : > { %v242_v15 = vrot.slane %v241_v14, 1 }
  0xbc   : > { %v243_v18 = vadd.f32 %v242_v15, %v241_v14 }
  0xbe   : > { %v245_v19 = vadd.f32 %v244_v17, %v243_v18 }
  0xc0   : > { %v246_v21 = vmax.f32 %v245_v19, 0.0 }
  0xc2   : > { %v251_v23 = vrot.slane %v246_v21, %v250_v20 }
  0xc4   : > { %v252_v24 = vmul.f32 %v251_v23, %v247_v22 }
  0xc6   : > { %v253_v25 = vsel %vm236_vm1, %v252_v24, 0.0 }
  0xc7   : > { %254 = vadd.xlane.f32.xlu0 %v253_v25 }
 0x154   : > { %v255_v28 = vpop.xlane.xlu0 %254 }
 0x155   : > { %v257_v29 = vadd.f32 %v256_v27, %v255_v28 }
 0x157   : > { %v258_v30 = vsub.f32 0.0, %v257_v29 }
 0x159   : > { %v259_v31 = vmul.f32 1.442695, %v258_v30 }
 0x15b   : > { %410 = vpow2.f32 %v259_v31 }
 0x165   : > { %v411_v32 = vpop.eup %410 }
 0x166   : > { %v261_v33 = vadd.f32 1.0, %v411_v32 }
 0x168   : > { %412 = vrcp.f32 %v261_v33 }
 0x172   : > { %v413_v34 = vpop.eup %412 }
 0x173   : > { %266 = vperm.xlu1 %407, %v413_v34  }
 0x1f2   : > { %v267_v39 = vpop.permute.xlu1 %266 }
 0x1f3   : > { %v274_v40 = vrot.slane %v267_v39, %v273_v38 }
 0x1f5   : > { %v276_v41 = vmul.f32 %v274_v40, %v223_v0 }
 0x1f7   : > { %277 = vst [vmem:[%s217_s30] sm:$0xff] %v276_v41 }
 0x1f8   : > { %427 = shalt.err (!%p424_p3)
}
 0x1f9   : > { %s428_s14 = scalar_lea.hbm %s583_s9, 128  ;;  %s432_s17 = scalar_lea.hbm %s630_s5, 256 }
 0x1fa   : > { %p429_p4 = scmp.ne.s32.totalorder %s583_s9, %s428_s14  ;;  %p433_p9 = scmp.lt.u32.totalorder %s583_s9, %s630_s5 }
 0x1fb   : > { %p434_p10 = scmp.lt.u32.totalorder %s432_s17, %s428_s14  ;;  %p436_p12 = scmp.lt.u32.totalorder %s428_s14, %s583_s9 }
 0x1fc   : > { %p430_p7 = pnand %p429_p4, %p549_p5 }
 0x1fd   : > { %p435_p11 = por %p434_p10, %p433_p9 }
 0x1fe   : > { %p431_p8 = pneg %p430_p7 }
 0x1ff   : > { %p437_p13 = por %p436_p12, %p435_p11 }
 0x201   : > { %p438_p0 = pnand %p437_p13, %p431_p8 }
 0x203   : > { %441 = shalt.err (!%p438_p0)
}
 0x204   : > { %366 = dma.vmem_to_hbm [thread:$0]  (%p549_p5), %s585_s6, 128, %s583_s9, %s279_s10  }
 0x205 PF: > { %p372_p1 = scmp.ge.s32.totalorder %s476_s21, 2  ;;  %s305_s26 = sand.u32 1, %s464_s18  }
 0x206   : > { %s306_s30 = scalar_lea.sflag [#allocation3], %s305_s26 }
 0x207   : > { %p369_p2 = pnand %p372_p1, %p553_p6 }
 0x209   : > { %459 = dma.done.wait (!%p369_p2), %s306_s30, 128  }
 0x20a   : > { %461 = vsyncadd (!%p369_p2), %s306_s30, 4294967168  ;;  %p15_p3 = scmp.ge.s32.totalorder %s536_s24, 4   ;;  %s633_s18 = smov %s468_s19 }
 0x20b   : > { %s634_s19 = smov %s472_s20  ;;  %s635_s20 = smov %s547_s27 }
 0x20c   : > { %s636_s21 = smov %s536_s24  ;;  %17 = sbr.rel (!%p15_p3) target bundleno = 3 (0x3), region = 75 }
 0x213   :  { %311 = vsyncpa [#allocation3], 1 }
 0x214   :  { %313 = vsyncpa [#allocation3 + $0x1], 1 }

</bundles_post_ra>
